<compile_context>
chip_gen: v5e
topology: v5e:2x2
jax: 0.10.0
libtpu: 0.0.40
codegen_flags: <defaults>
</compile_context>

<pallas_src>
import jax
import jax.numpy as jnp
from jax.experimental import pallas as pl
from jax.experimental.pallas import tpu as pltpu


def _actnorm_affine_kernel(x_ref, s_ref, loc_ref, out_ref):
    # x_ref: (TB, D) tile; s_ref / loc_ref: (1, D), broadcast across the rows.
    out_ref[...] = (x_ref[...] * s_ref[...] + loc_ref[...]).astype(out_ref.dtype)


def _choose_block_rows(B, D, itemsize, vmem_budget_bytes=8 * 1024 * 1024):
    """Largest row tile whose double-buffered (x in + out) tiles fit the budget.

    Budget is kept well under the smallest default scoped-VMEM limit across
    generations (16 MiB on v5e, 32 MiB on v6e/v7x, and v7x's 64 MiB physical),
    so no vmem_limit_bytes override is needed:
        2 arrays (x, out) * 2 pipeline buffers * TB * D * itemsize <= budget.
    """
    sub = 16 if itemsize < 4 else 8           # bf16 packs 16 rows per sublane tile
    tb = vmem_budget_bytes // (4 * D * itemsize)
    tb = max(sub, (tb // sub) * sub)
    tb = min(tb, 1024)                        # ~512-1024 row tiles already saturate HBM BW
    if tb >= B:
        return B                              # whole batch fits in one block
    return tb


def actnorm_forward(x, scale, loc, *, use_exp=False, block_rows=None):
    """ActNorm.forward: returns (out, log_det)."""
    B, D = x.shape
    scale_f32 = scale.astype(jnp.float32)
    loc_f32 = loc.astype(jnp.float32)

    # Parameter transform + log-det: O(D) work, done once outside the
    # bandwidth-bound kernel (the same `s` is needed for log_det anyway).
    if use_exp:
        s = jnp.exp(scale_f32)
        log_det = jnp.sum(scale_f32)
    else:
        s = jax.nn.softplus(scale_f32)
        log_det = jnp.sum(jnp.log(s))

    s2 = s.reshape(1, D)
    loc2 = loc_f32.reshape(1, D)

    tb = block_rows if block_rows is not None else _choose_block_rows(
        B, D, x.dtype.itemsize)

    out = pl.pallas_call(
        _actnorm_affine_kernel,
        out_shape=jax.ShapeDtypeStruct((B, D), x.dtype),
        grid=(pl.cdiv(B, tb),),
        in_specs=[
            pl.BlockSpec((tb, D), lambda i: (i, 0)),   # x tile (pipelined)
            pl.BlockSpec((1, D), lambda i: (0, 0)),    # s, same block every step
            pl.BlockSpec((1, D), lambda i: (0, 0)),    # loc, same block every step
        ],
        out_specs=pl.BlockSpec((tb, D), lambda i: (i, 0)),   # lane-dense, full D
        compiler_params=pltpu.CompilerParams(
            # Batch tiles are independent: shard across TensorCores on v7x,
            # harmless on single-TC v5e/v6e.
            dimension_semantics=("parallel",),
        ),
    )(x, s2, loc2)

    return out, log_det


if __name__ == "__main__":
    # Small shapes consistent with ActNorm's (batch, x_dim) input convention.
    B, D = 8, 128

    key = jax.random.PRNGKey(0)
    kx, ks, kl = jax.random.split(key, 3)
    x = jax.random.normal(kx, (B, D), dtype=jnp.float32)

    # Module __init__ sets loc = ones(x_dim), scale = ones(x_dim); perturb them
    # deterministically so broadcasting / softplus is exercised.
    scale = jnp.ones((D,), jnp.float32) + 0.1 * jax.random.normal(ks, (D,), jnp.float32)
    loc = jnp.ones((D,), jnp.float32) + 0.1 * jax.random.normal(kl, (D,), jnp.float32)

    out, log_det = actnorm_forward(x, scale, loc, use_exp=False)
    out = jax.block_until_ready(out)
    log_det = jax.block_until_ready(log_det)

    # Pure-JAX reference check (same math as the PyTorch forward).
    s_ref = jax.nn.softplus(scale)
    out_ref = x * s_ref[None, :] + loc[None, :]
    logdet_ref = jnp.sum(jnp.log(s_ref))
    assert jnp.allclose(out, out_ref, atol=1e-5, rtol=1e-5)
    assert jnp.allclose(log_det, logdet_ref, atol=1e-5, rtol=1e-5)

    # Also exercise the use_exp=True branch once.
    out_e, log_det_e = actnorm_forward(x, scale, loc, use_exp=True)
    jax.block_until_ready(out_e)
    assert jnp.allclose(out_e, x * jnp.exp(scale)[None, :] + loc[None, :],
                        atol=1e-5, rtol=1e-5)
    assert jnp.allclose(log_det_e, jnp.sum(scale), atol=1e-5, rtol=1e-5)

    # Exercise the multi-step gridded path, including a partial trailing block
    # (B2 = 20 rows with 8-row tiles -> 3 grid steps, last one masked on writeback).
    B2, D2 = 20, 256
    k2x, k2s, k2l = jax.random.split(jax.random.PRNGKey(1), 3)
    x2 = jax.random.normal(k2x, (B2, D2), dtype=jnp.float32)
    scale2 = 0.5 * jax.random.normal(k2s, (D2,), jnp.float32)
    loc2 = jax.random.normal(k2l, (D2,), jnp.float32)
    out2, log_det2 = actnorm_forward(x2, scale2, loc2, use_exp=False, block_rows=8)
    jax.block_until_ready(out2)
    s2_ref = jax.nn.softplus(scale2)
    assert jnp.allclose(out2, x2 * s2_ref[None, :] + loc2[None, :], atol=1e-5, rtol=1e-5)
    assert jnp.allclose(log_det2, jnp.sum(jnp.log(s2_ref)), atol=1e-5, rtol=1e-5)

    print("KERNEL_OK")
</pallas_src>

<mosaic_0001>
module attributes {stable_mosaic.version = 11 : i64} {
  func.func @_actnorm_affine_kernel(%arg0: i32, %arg1: memref<8x128xf32, #tpu.memory_space<vmem>>, %arg2: memref<1x128xf32, #tpu.memory_space<vmem>>, %arg3: memref<1x128xf32, #tpu.memory_space<vmem>>, %arg4: memref<8x128xf32, #tpu.memory_space<vmem>>) attributes {dimension_semantics = [#tpu.dimension_semantics<parallel>], iteration_bounds = array<i64: 1>, scalar_prefetch = 0 : i64, scratch_operands = 0 : i64, tpu.core_type = #tpu.core_type<tc>, window_params = [{transform_indices = @transform_0, window_bounds = array<i64: 8, 128>}, {pipeline_mode = #tpu.pipeline_mode<synchronous>, transform_indices = @transform_1, window_bounds = array<i64: 1, 128>}, {pipeline_mode = #tpu.pipeline_mode<synchronous>, transform_indices = @transform_2, window_bounds = array<i64: 1, 128>}, {transform_indices = @transform_3, window_bounds = array<i64: 8, 128>}]} {
    %c0 = arith.constant 0 : index
    %c0_0 = arith.constant 0 : index
    %0 = vector.load %arg1[%c0, %c0_0] : memref<8x128xf32, #tpu.memory_space<vmem>>, vector<8x128xf32>
    %c0_1 = arith.constant 0 : index
    %c0_2 = arith.constant 0 : index
    %1 = vector.load %arg2[%c0_1, %c0_2] : memref<1x128xf32, #tpu.memory_space<vmem>>, vector<1x128xf32>
    %2 = vector.broadcast %1 : vector<1x128xf32> to vector<8x128xf32>
    %3 = arith.mulf %0, %2 : vector<8x128xf32>
    %c0_3 = arith.constant 0 : index
    %c0_4 = arith.constant 0 : index
    %4 = vector.load %arg3[%c0_3, %c0_4] : memref<1x128xf32, #tpu.memory_space<vmem>>, vector<1x128xf32>
    %5 = vector.broadcast %4 : vector<1x128xf32> to vector<8x128xf32>
    %6 = arith.addf %3, %5 : vector<8x128xf32>
    %c0_5 = arith.constant 0 : index
    %c0_6 = arith.constant 0 : index
    %7 = vector.load %arg4[%c0_5, %c0_6] : memref<8x128xf32, #tpu.memory_space<vmem>>, vector<8x128xf32>
    tpu.vector_store %arg4[%c0_5, %c0_6], %6 {strides = array<i32>} : memref<8x128xf32, #tpu.memory_space<vmem>>, vector<8x128xf32>,
    return
  }
  func.func @transform_0(%arg0: i32) -> (i32, i32) {
    %c0_i32 = arith.constant 0 : i32
    %c0_i32_0 = arith.constant 0 : i32
    return %arg0, %c0_i32 : i32, i32
  }
  func.func @transform_1(%arg0: i32) -> (i32, i32) {
    %c0_i32 = arith.constant 0 : i32
    %c0_i32_0 = arith.constant 0 : i32
    %c0_i32_1 = arith.constant 0 : i32
    return %c0_i32, %c0_i32_0 : i32, i32
  }
  func.func @transform_2(%arg0: i32) -> (i32, i32) {
    %c0_i32 = arith.constant 0 : i32
    %c0_i32_0 = arith.constant 0 : i32
    %c0_i32_1 = arith.constant 0 : i32
    return %c0_i32, %c0_i32_0 : i32, i32
  }
  func.func @transform_3(%arg0: i32) -> (i32, i32) {
    %c0_i32 = arith.constant 0 : i32
    %c0_i32_0 = arith.constant 0 : i32
    return %arg0, %c0_i32 : i32, i32
  }
}

</mosaic_0001>

<bundles_post_ra>
// kernel: tpu_custom_call.1
= control target key start
LH: loop header
LB: loop body
LE: loop exit
PB: predicated region body
PF: predicated region fallthrough
CT: control target
= control target key end

     0   :  { %8 = vsyncpa [#allocation3], 0  ;;  %s191_s0 = inlined_call_operand.hbm [shape: f32[8,128], index: 0, kind: input, shape index: {}]   ;;  %s192_s1 = inlined_call_operand.hbm [shape: f32[1,128], index: 1, kind: input, shape index: {}]   ;;  %s193_s2 = inlined_call_operand.vmem [shape: f32[1,128], index: 2, kind: input, shape index: {}]   ;;  %s194_s3 = inlined_call_operand.hbm [shape: f32[8,128], index: 3, kind: output, shape index: {}]  }
   0x1   :  { %9 = vsyncpa [#allocation6], 0 }
   0x2   :  { %10 = vsyncpa [#allocation4], 0  ;;  %s16_s14 = sshll.u32 %s191_s0, 4  ;;  %s156_s15 = smov [#allocation2]   ;;  %s17_s14 = int_to_ptr.hbm [resolvable:$true] %s16_s14 }
   0x3   :  { %s18_s16 = sshll.u32 %s156_s15, 4  ;;  %s27_s19 = sshll.u32 %s192_s1, 4  ;;  %s19_s16 = int_to_ptr.vmem [resolvable:$true] %s18_s16  ;;  %s28_s19 = int_to_ptr.hbm [resolvable:$true] %s27_s19 }
   0x4   :  { %21 = dma.hbm_to_vmem [thread:$0]  %s17_s14, 128, %s19_s16, [#allocation3]  }
   0x5   :  { %s157_s20 = smov [#allocation5]  }
   0x6   :  { %s29_s21 = sshll.u32 %s157_s20, 4  ;;  %s30_s21 = int_to_ptr.vmem [resolvable:$true] %s29_s21 }
   0x7   :  { %32 = dma.hbm_to_vmem [thread:$0]  %s28_s19, 16, %s30_s21, [#allocation6]  }
   0x8   :  { %150 = dma.done.wait [#allocation3], 128  }
   0x9   :  { %151 = vsyncadd [#allocation3], 4294967168 }
   0xa   :  { %152 = dma.done.wait [#allocation6], 16  }
   0xb   :  { %153 = vsyncadd [#allocation6], 4294967280  ;;  %v43_v0 = vld [vmem:[#allocation2] sm:$0xff]  ;;  %v76_v1 = vld [vmem:[#allocation5] ss:$0 sm:$0xff]  ;;  %s158_s23 = smov [#allocation7]  }
   0xc   :  { %v77_v2 = vld [vmem:[%s193_s2] ss:$0 sm:$0xff]  ;;  %s60_s24 = sshll.u32 %s158_s23, 4  ;;  %s62_s26 = sshll.u32 %s194_s3, 4  ;;  %v48_v3 = vmul.f32 %v76_v1, %v43_v0  ;;  %s61_s24 = int_to_ptr.vmem [resolvable:$true] %s60_s24  ;;  %s63_s26 = int_to_ptr.hbm [resolvable:$true] %s62_s26 }
   0xe   :  { %v53_v4 = vadd.f32 %v77_v2, %v48_v3 }
  0x10   :  { %54 = vst [vmem:[#allocation7] sm:$0xff] %v53_v4 }
  0x11   :  { %65 = dma.vmem_to_hbm [thread:$0]  %s61_s24, 128, %s63_s26, [#allocation4]  }
  0x12   :  { %154 = dma.done.wait [#allocation4], 128  }
  0x13   :  { %155 = vsyncadd [#allocation4], 4294967168 }
  0x14   :  { %70 = vsyncpa [#allocation3], 1 }
  0x15   :  { %71 = vsyncpa [#allocation6], 1 }
  0x16   :  { %72 = vsyncpa [#allocation4], 1 }

</bundles_post_ra>
